<compile_context>
chip_gen: v7x
topology: tpu7x:2x2x1
jax: 0.10.0
libtpu: 0.0.40
codegen_flags: <defaults>
</compile_context>

<pallas_src>
import jax
import jax.numpy as jnp
from jax.experimental import pallas as pl
from jax.experimental.pallas import tpu as pltpu

# Shapes from the PyTorch module: nn.Linear(512, 256), x1 = randn(16, 512).
M, K, N = 16, 512, 256


def linear2x_relu_kernel(x_ref, w_ref, b_ref, o_ref):
    # v1 = linear(x1);  v2 = v1 + v1 (x2 pre-folded into W, b);  v3 = relu(v2)
    # TODO(synk): original module does `v2 = v1 + v2` with v2 undefined (bug in
    # the fuzz-generated source); interpreted as `v2 = v1 + v1`. Confirm with
    # the model owner — `v2 = v1` (no doubling) would change the folded params.
    acc = jnp.dot(x_ref[...], w_ref[...], preferred_element_type=jnp.float32)
    # f32 epilogue (bias + relu), cast only at the final store (v5e-safe).
    o_ref[...] = jnp.maximum(acc + b_ref[...], 0.0).astype(o_ref.dtype)


def model_forward(x_bf16, w2_bf16, b2_f32, *, tm=256):
    """relu(2 * (x @ W + b)) with the x2 folded into (w2_bf16, b2_f32).

    m <= tm : gridless single shot (whole problem VMEM-resident).
    m  > tm : 1-D grid over batch tiles; weight index_map is constant so the
              weight tile is DMA'd once and stays VMEM-resident across steps.
    """
    m, k = x_bf16.shape
    n = w2_bf16.shape[1]

    if m <= tm:
        return pl.pallas_call(
            linear2x_relu_kernel,
            out_shape=jax.ShapeDtypeStruct((m, n), jnp.float32),
            in_specs=[
                pl.BlockSpec(memory_space=pltpu.MemorySpace.VMEM),
                pl.BlockSpec(memory_space=pltpu.MemorySpace.VMEM),
                pl.BlockSpec(memory_space=pltpu.MemorySpace.VMEM),
            ],
            out_specs=pl.BlockSpec(memory_space=pltpu.MemorySpace.VMEM),
            cost_estimate=pl.CostEstimate(
                flops=2 * m * k * n,
                transcendentals=0,
                bytes_accessed=m * k * 2 + k * n * 2 + n * 4 + m * n * 4,
            ),
        )(x_bf16, w2_bf16, b2_f32)

    # Batched path: amortize fixed call/DMA overhead; keep weights resident.
    n_tiles = pl.cdiv(m, tm)
    m_pad = n_tiles * tm
    if m_pad != m:
        x_bf16 = jnp.pad(x_bf16, ((0, m_pad - m), (0, 0)))

    out = pl.pallas_call(
        linear2x_relu_kernel,
        out_shape=jax.ShapeDtypeStruct((m_pad, n), jnp.float32),
        grid=(n_tiles,),
        in_specs=[
            pl.BlockSpec((tm, k), lambda i: (i, 0)),
            pl.BlockSpec((k, n), lambda i: (0, 0)),  # constant -> DMA'd once, resident
            pl.BlockSpec((1, n), lambda i: (0, 0)),
        ],
        out_specs=pl.BlockSpec((tm, n), lambda i: (i, 0)),
        compiler_params=pltpu.CompilerParams(
            dimension_semantics=("parallel",),  # v7x megacore splits the batch
        ),
        cost_estimate=pl.CostEstimate(
            flops=2 * m_pad * k * n,
            transcendentals=0,
            bytes_accessed=m_pad * k * 2 + k * n * 2 + n * 4 + m_pad * n * 4,
        ),
    )(x_bf16, w2_bf16, b2_f32)
    return out[:m]


def reference_bf16(x_bf16, w2_bf16, b2_f32):
    # Same bf16-in / f32-accumulate semantics as the kernel's MXU dot.
    v = jnp.dot(x_bf16, w2_bf16, preferred_element_type=jnp.float32) + b2_f32
    return jnp.maximum(v, 0.0)


def reference_f32(x_f32, w_t_f32, b_f32):
    # Unfolded PyTorch f32 semantics: v1 = x @ W.T + b; relu(v1 + v1).
    v1 = x_f32 @ w_t_f32 + b_f32
    return jnp.maximum(v1 + v1, 0.0)


if __name__ == "__main__":
    key = jax.random.PRNGKey(0)
    kx, kw, kb, kxb = jax.random.split(key, 4)

    # Deterministic parameter init (shapes from nn.Linear(512, 256)).
    # PyTorch weight is (out, in); we keep the transposed (in, out) form.
    bound = 1.0 / jnp.sqrt(K)
    w_t = jax.random.uniform(kw, (K, N), jnp.float32, -bound, bound)
    b = jax.random.uniform(kb, (1, N), jnp.float32, -bound, bound)

    # Fold the x2 (from v1 + v1) into the parameters once at init.
    w2_bf16 = (2.0 * w_t).astype(jnp.bfloat16)
    b2_f32 = 2.0 * b

    x1 = jax.random.normal(kx, (M, K), jnp.float32)
    x1_bf16 = x1.astype(jnp.bfloat16)

    # --- module-shaped input (16, 512): gridless fast path ---
    out = jax.block_until_ready(model_forward(x1_bf16, w2_bf16, b2_f32))
    assert out.shape == (M, N)
    assert out.dtype == jnp.float32

    # Strict check vs the same bf16/f32-accumulate math the kernel performs.
    ref_same = reference_bf16(x1_bf16, w2_bf16, b2_f32)
    assert jnp.allclose(out, ref_same, atol=1e-4, rtol=1e-4), "mismatch vs bf16 ref"

    # Loose check vs the unfolded f32 PyTorch semantics (bf16 cast ~1e-2 error).
    ref_full = reference_f32(x1, w_t, b)
    assert jnp.allclose(out, ref_full, atol=5e-2, rtol=5e-2), "mismatch vs f32 ref"

    # --- batched path: grid over batch tiles, weight stays VMEM-resident ---
    MB = 128
    xb = jax.random.normal(kxb, (MB, K), jnp.float32).astype(jnp.bfloat16)
    out_b = jax.block_until_ready(model_forward(xb, w2_bf16, b2_f32, tm=64))
    ref_b = reference_bf16(xb, w2_bf16, b2_f32)
    assert out_b.shape == (MB, N)
    assert jnp.allclose(out_b, ref_b, atol=1e-4, rtol=1e-4), "mismatch (batched path)"

    print("KERNEL_OK")
</pallas_src>

<mosaic_0001>
module attributes {stable_mosaic.version = 11 : i64} {
  func.func @linear2x_relu_kernel(%arg0: memref<16x512xbf16, #tpu.memory_space<vmem>>, %arg1: memref<512x256xbf16, #tpu.memory_space<vmem>>, %arg2: memref<1x256xf32, #tpu.memory_space<vmem>>, %arg3: memref<16x256xf32, #tpu.memory_space<vmem>>) attributes {dimension_semantics = [], scalar_prefetch = 0 : i64, scratch_operands = 0 : i64, tpu.core_type = #tpu.core_type<tc>} {
    %c0 = arith.constant 0 : index
    %c0_0 = arith.constant 0 : index
    %0 = vector.load %arg0[%c0, %c0_0] : memref<16x512xbf16, #tpu.memory_space<vmem>>, vector<16x512xbf16>
    %c0_1 = arith.constant 0 : index
    %c0_2 = arith.constant 0 : index
    %1 = vector.load %arg1[%c0_1, %c0_2] : memref<512x256xbf16, #tpu.memory_space<vmem>>, vector<512x256xbf16>
    %cst = arith.constant dense<0.000000e+00> : vector<16x256xf32>
    %2 = tpu.matmul %0, %1, %cst {dimension_numbers = #tpu.dot_dimension_numbers<[1], [0], [0], [1], [0, 0, 1, 1], [], []>} : vector<16x512xbf16>, vector<512x256xbf16>, vector<16x256xf32> -> vector<16x256xf32>
    %c0_3 = arith.constant 0 : index
    %c0_4 = arith.constant 0 : index
    %3 = vector.load %arg2[%c0_3, %c0_4] : memref<1x256xf32, #tpu.memory_space<vmem>>, vector<1x256xf32>
    %4 = vector.broadcast %3 : vector<1x256xf32> to vector<16x256xf32>
    %5 = arith.addf %2, %4 : vector<16x256xf32>
    %cst_5 = arith.constant 0.000000e+00 : f32
    %6 = vector.broadcast %cst_5 : f32 to vector<16x256xf32>
    %7 = arith.maximumf %5, %6 : vector<16x256xf32>
    %c0_6 = arith.constant 0 : index
    %c0_7 = arith.constant 0 : index
    %8 = vector.load %arg3[%c0_6, %c0_7] : memref<16x256xf32, #tpu.memory_space<vmem>>, vector<16x256xf32>
    tpu.vector_store %arg3[%c0_6, %c0_7], %7 {strides = array<i32>} : memref<16x256xf32, #tpu.memory_space<vmem>>, vector<16x256xf32>,
    return
  }
}

</mosaic_0001>

<bundles_post_ra>
// kernel: tpu_custom_call.1
= control target key start
LH: loop header
LB: loop body
LE: loop exit
PB: predicated region body
PF: predicated region fallthrough
CT: control target
= control target key end

     0   :  { %8 = vsyncpa [#allocation3], 0  ;;  %s904_s0 = inlined_call_operand.hbm [shape: bf16[16,512], index: 0, kind: input, shape index: {}]   ;;  %s905_s1 = inlined_call_operand.hbm [shape: bf16[512,256], index: 1, kind: input, shape index: {}]   ;;  %s906_s2 = inlined_call_operand.vmem [shape: f32[1,256], index: 2, kind: input, shape index: {}]   ;;  %s907_s3 = inlined_call_operand.hbm [shape: f32[16,256], index: 3, kind: output, shape index: {}]  }
   0x1   :  { %9 = vsyncpa [#allocation6], 0 }
   0x2   :  { %10 = vsyncpa [#allocation4], 0  ;;  %s832_s12 = smov [#allocation2]   ;;  %s760_s16 = scalar_lea.hbm %s904_s0, 512 }
   0x3   :  { %s16_s13 = sshll.u32 %s832_s12, 4  ;;  %p761_p0 = scmp.ne.s32.totalorder %s904_s0, %s760_s16  ;;  %s17_s13 = int_to_ptr.vmem [resolvable:$true] %s16_s13 }
   0x4   :  { %p764_p1 = scmp.lt.u32.totalorder %s760_s16, %s904_s0 }
   0x6   :  { %p766_p2 = pnand %p764_p1, %p761_p0 }
   0x8   :  { %769 = shalt.err (!%p766_p2)
}
   0x9   :  { %s770_s21 = scalar_lea.vmem %s17_s13, 512  ;;  %p775_p4 = scmp.lt.s32.totalorder %s17_s13, %s17_s13 }
   0xa   :  { %p771_p3 = scmp.ne.s32.totalorder %s17_s13, %s770_s21  ;;  %p776_p5 = scmp.lt.s32.totalorder %s770_s21, %s770_s21 }
   0xc   :  { %p777_p6 = por %p776_p5, %p775_p4 }
   0xe   :  { %p778_p7 = pnand %p777_p6, %p771_p3 }
  0x10   :  { %781 = shalt.err (!%p778_p7)
}
  0x11   :  { %s833_s22 = smov 256   ;;  %s834_s23 = smov 16  }
  0x12   :  { %22 = dma.hbm_to_vmem [thread:$0]  %s904_s0, 512, %s17_s13, [#allocation3], %s833_s22, %s833_s22, %s834_s23  }
  0x13   :  { %s835_s26 = smov [#allocation5]   ;;  %s782_s30 = scalar_lea.hbm %s905_s1, 8192 }
  0x14   :  { %s28_s27 = sshll.u32 %s835_s26, 4  ;;  %p783_p8 = scmp.ne.s32.totalorder %s905_s1, %s782_s30  ;;  %s29_s27 = int_to_ptr.vmem [resolvable:$true] %s28_s27 }
  0x15   :  { %p786_p9 = scmp.lt.u32.totalorder %s782_s30, %s905_s1 }
  0x17   :  { %p788_p10 = pnand %p786_p9, %p783_p8 }
  0x19   :  { %791 = shalt.err (!%p788_p10)
}
  0x1a   :  { %s792_s8 = scalar_lea.vmem %s29_s27, 8192  ;;  %p797_p12 = scmp.lt.s32.totalorder %s29_s27, %s29_s27 }
  0x1b   :  { %p793_p11 = scmp.ne.s32.totalorder %s29_s27, %s792_s8  ;;  %p798_p13 = scmp.lt.s32.totalorder %s792_s8, %s792_s8 }
  0x1d   :  { %p799_p0 = por %p798_p13, %p797_p12 }
  0x1f   :  { %p800_p1 = pnand %p799_p0, %p793_p11 }
  0x21   :  { %803 = shalt.err (!%p800_p1)
}
  0x22   :  { %s836_s0 = smov 128   ;;  %s837_s9 = smov 8  }
  0x23   :  { %34 = dma.hbm_to_vmem [thread:$0]  %s905_s1, 8192, %s29_s27, [#allocation6], %s836_s0, %s836_s0, %s837_s9  }
  0x24   :  { %826 = dma.done.wait [#allocation3], 512  }
  0x25   :  { %827 = vsyncadd [#allocation3], 4294966784 }
  0x26   :  { %828 = dma.done.wait [#allocation6], 8192  }
  0x27   :  { %829 = vsyncadd [#allocation6], 4294959104  ;;  %v658_v0 = vld [vmem:[#allocation5 + $0x4] ss:$8 sps:$4 sm:$0xff]   ;;  %v662_v2 = vld [vmem:[#allocation5] ss:$8 sps:$4 sm:$0xff]  }
  0x28   :  { %v660_v1 = vld [vmem:[#allocation5 + $0x104] ss:$8 sps:$4 sm:$0xff]   ;;  %463 = vmatprep.subr.bf16.mxu1 %v658_v0  ;;  %v663_v3 = vld [vmem:[#allocation5 + $0x100] ss:$8 sps:$4 sm:$0xff]   ;;  %v664_v4 = vld [vmem:[#allocation5 + $0x14] ss:$8 sps:$4 sm:$0xff]  }
  0x29   :  { %506 = vmatprep.subr.bf16.mxu0 %v660_v1  ;;  %464 = vmatpush1.bf16.msra.mxu1 %v662_v2  ;;  %v666_v5 = vld [vmem:[#allocation5 + $0x114] ss:$8 sps:$4 sm:$0xff]   ;;  %v668_v6 = vld [vmem:[#allocation5 + $0x10] ss:$8 sps:$4 sm:$0xff]   ;;  %v670_v8 = vld [vmem:[#allocation5 + $0x24] ss:$8 sps:$4 sm:$0xff]  }
  0x2a   :  { %507 = vmatpush1.bf16.msra.mxu0 %v663_v3  ;;  %465 = vmatprep.subr.bf16.mxu1 %v664_v4  ;;  %v669_v7 = vld [vmem:[#allocation5 + $0x110] ss:$8 sps:$4 sm:$0xff]   ;;  %v672_v9 = vld [vmem:[#allocation5 + $0x124] ss:$8 sps:$4 sm:$0xff]   ;;  %v674_v10 = vld [vmem:[#allocation5 + $0x20] ss:$8 sps:$4 sm:$0xff]   ;;  %v113_v4 = vlaneseq }
  0x2b   :  { %508 = vmatprep.subr.bf16.mxu0 %v666_v5  ;;  %v675_v11 = vld [vmem:[#allocation5 + $0x120] ss:$8 sps:$4 sm:$0xff]   ;;  %v676_v12 = vld [vmem:[#allocation5 + $0x34] ss:$8 sps:$4 sm:$0xff]   ;;  %v680_v14 = vld [vmem:[#allocation5 + $0x30] ss:$8 sps:$4 sm:$0xff]  }
  0x2c   :  { %v678_v13 = vld [vmem:[#allocation5 + $0x134] ss:$8 sps:$4 sm:$0xff]   ;;  %v681_v15 = vld [vmem:[#allocation5 + $0x130] ss:$8 sps:$4 sm:$0xff]   ;;  %v682_v16 = vld [vmem:[#allocation5 + $0x44] ss:$8 sps:$4 sm:$0xff]  }
  0x2d   :  { %466 = vmatpush1.bf16.msra.mxu1 %v668_v6  ;;  %v684_v17 = vld [vmem:[#allocation5 + $0x144] ss:$8 sps:$4 sm:$0xff]   ;;  %v686_v18 = vld [vmem:[#allocation5 + $0x40] ss:$8 sps:$4 sm:$0xff]   ;;  %v688_v20 = vld [vmem:[#allocation5 + $0x54] ss:$8 sps:$4 sm:$0xff]  }
  0x2e   :  { %509 = vmatpush1.bf16.msra.mxu0 %v669_v7  ;;  %467 = vmatprep.subr.bf16.mxu1 %v670_v8  ;;  %v687_v19 = vld [vmem:[#allocation5 + $0x140] ss:$8 sps:$4 sm:$0xff]   ;;  %v690_v21 = vld [vmem:[#allocation5 + $0x154] ss:$8 sps:$4 sm:$0xff]   ;;  %v692_v22 = vld [vmem:[#allocation5 + $0x50] ss:$8 sps:$4 sm:$0xff]  }
  0x2f   :  { %510 = vmatprep.subr.bf16.mxu0 %v672_v9  ;;  %v693_v23 = vld [vmem:[#allocation5 + $0x150] ss:$8 sps:$4 sm:$0xff]   ;;  %v694_v24 = vld [vmem:[#allocation5 + $0x64] ss:$8 sps:$4 sm:$0xff]   ;;  %v698_v26 = vld [vmem:[#allocation5 + $0x60] ss:$8 sps:$4 sm:$0xff]  }
  0x30   :  { %v696_v25 = vld [vmem:[#allocation5 + $0x164] ss:$8 sps:$4 sm:$0xff]   ;;  %v699_v27 = vld [vmem:[#allocation5 + $0x160] ss:$8 sps:$4 sm:$0xff]   ;;  %v700_v28 = vld [vmem:[#allocation5 + $0x74] ss:$8 sps:$4 sm:$0xff]  }
  0x31   :  { %468 = vmatpush1.bf16.msra.mxu1 %v674_v10  ;;  %v702_v29 = vld [vmem:[#allocation5 + $0x174] ss:$8 sps:$4 sm:$0xff]   ;;  %v704_v30 = vld [vmem:[#allocation5 + $0x70] ss:$8 sps:$4 sm:$0xff]   ;;  %v706_v32 = vld [vmem:[#allocation5 + $0x84] ss:$8 sps:$4 sm:$0xff]  }
  0x32   :  { %511 = vmatpush1.bf16.msra.mxu0 %v675_v11  ;;  %469 = vmatprep.subr.bf16.mxu1 %v676_v12  ;;  %v705_v31 = vld [vmem:[#allocation5 + $0x170] ss:$8 sps:$4 sm:$0xff]   ;;  %v708_v33 = vld [vmem:[#allocation5 + $0x184] ss:$8 sps:$4 sm:$0xff]   ;;  %v710_v34 = vld [vmem:[#allocation5 + $0x80] ss:$8 sps:$4 sm:$0xff]  }
  0x33   :  { %512 = vmatprep.subr.bf16.mxu0 %v678_v13  ;;  %v711_v35 = vld [vmem:[#allocation5 + $0x180] ss:$8 sps:$4 sm:$0xff]   ;;  %v712_v36 = vld [vmem:[#allocation5 + $0x94] ss:$8 sps:$4 sm:$0xff]   ;;  %v716_v38 = vld [vmem:[#allocation5 + $0x90] ss:$8 sps:$4 sm:$0xff]  }
  0x34   :  { %v714_v37 = vld [vmem:[#allocation5 + $0x194] ss:$8 sps:$4 sm:$0xff]   ;;  %v717_v39 = vld [vmem:[#allocation5 + $0x190] ss:$8 sps:$4 sm:$0xff]   ;;  %v718_v40 = vld [vmem:[#allocation5 + $0xa4] ss:$8 sps:$4 sm:$0xff]  }
  0x35   :  { %470 = vmatpush1.bf16.msra.mxu1 %v680_v14  ;;  %v720_v41 = vld [vmem:[#allocation5 + $0x1a4] ss:$8 sps:$4 sm:$0xff]   ;;  %v722_v42 = vld [vmem:[#allocation5 + $0xa0] ss:$8 sps:$4 sm:$0xff]   ;;  %v724_v44 = vld [vmem:[#allocation5 + $0xb4] ss:$8 sps:$4 sm:$0xff]  }
  0x36   :  { %513 = vmatpush1.bf16.msra.mxu0 %v681_v15  ;;  %471 = vmatprep.subr.bf16.mxu1 %v682_v16  ;;  %v723_v43 = vld [vmem:[#allocation5 + $0x1a0] ss:$8 sps:$4 sm:$0xff]   ;;  %v726_v45 = vld [vmem:[#allocation5 + $0x1b4] ss:$8 sps:$4 sm:$0xff]   ;;  %v728_v46 = vld [vmem:[#allocation5 + $0xb0] ss:$8 sps:$4 sm:$0xff]  }
  0x37   :  { %514 = vmatprep.subr.bf16.mxu0 %v684_v17  ;;  %v756_v47 = vld [vmem:[#allocation2 + $0x4] ss:$16 sps:$4 sm:$0xff]   ;;  %v729_v48 = vld [vmem:[#allocation5 + $0x1b0] ss:$8 sps:$4 sm:$0xff]   ;;  %v759_v51 = vld [vmem:[#allocation2 + $0xc] ss:$16 sps:$4 sm:$0xff]  }
  0x38   :  { %v730_v49 = vld [vmem:[#allocation5 + $0xc4] ss:$8 sps:$4 sm:$0xff]   ;;  %495 = vmatprep.mubr.bf16.mxu1 %v756_v47  ;;  %538 = vmatprep.mubr.bf16.mxu0 %v759_v51  ;;  %v734_v52 = vld [vmem:[#allocation5 + $0xc0] ss:$8 sps:$4 sm:$0xff]   ;;  %v736_v54 = vld [vmem:[#allocation5 + $0xd4] ss:$8 sps:$4 sm:$0xff]  }
  0x39   :  { %472 = vmatpush1.bf16.msra.mxu1 %v686_v18  ;;  %v732_v50 = vld [vmem:[#allocation5 + $0x1c4] ss:$8 sps:$4 sm:$0xff]   ;;  %v735_v53 = vld [vmem:[#allocation5 + $0x1c0] ss:$8 sps:$4 sm:$0xff]   ;;  %v738_v55 = vld [vmem:[#allocation5 + $0x1d4] ss:$8 sps:$4 sm:$0xff]  }
  0x3a   :  { %515 = vmatpush1.bf16.msra.mxu0 %v687_v19  ;;  %473 = vmatprep.subr.bf16.mxu1 %v688_v20  ;;  %v740_v56 = vld [vmem:[#allocation5 + $0xd0] ss:$8 sps:$4 sm:$0xff]   ;;  %v742_v58 = vld [vmem:[#allocation5 + $0xe4] ss:$8 sps:$4 sm:$0xff]   ;;  %v746_v60 = vld [vmem:[#allocation5 + $0xe0] ss:$8 sps:$4 sm:$0xff]  }
  0x3b   :  { %516 = vmatprep.subr.bf16.mxu0 %v690_v21  ;;  %v741_v57 = vld [vmem:[#allocation5 + $0x1d0] ss:$8 sps:$4 sm:$0xff]   ;;  %v744_v59 = vld [vmem:[#allocation5 + $0x1e4] ss:$8 sps:$4 sm:$0xff]   ;;  %v747_v61 = vld [vmem:[#allocation5 + $0x1e0] ss:$8 sps:$4 sm:$0xff]  }
  0x3c   :  { %v748_v62 = vld [vmem:[#allocation5 + $0xf4] ss:$8 sps:$4 sm:$0xff]   ;;  %v752_v0 = vld [vmem:[#allocation5 + $0xf0] ss:$8 sps:$4 sm:$0xff]   ;;  %v114_v5 = vshrl.u32 %v113_v4, 7 }
  0x3d   :  { %474 = vmatpush1.bf16.msra.mxu1 %v692_v22  ;;  %v750_v63 = vld [vmem:[#allocation5 + $0x1f4] ss:$8 sps:$4 sm:$0xff]   ;;  %v753_v1 = vld [vmem:[#allocation5 + $0x1f0] ss:$8 sps:$4 sm:$0xff]   ;;  %v111_v7 = vld [vmem:[%s906_s2] sm:$0x3] }
  0x3e   :  { %517 = vmatpush1.bf16.msra.mxu0 %v693_v23  ;;  %475 = vmatprep.subr.bf16.mxu1 %v694_v24  ;;  %v754_v2 = vld [vmem:[#allocation2] ss:$16 sps:$4 sm:$0xff]   ;;  %v757_v3 = vld [vmem:[#allocation2 + $0x8] ss:$16 sps:$4 sm:$0xff]   ;;  %v115_v6 = vsub.s32 0, %v114_v5  ;;  %v119_v8 = vsub.s32 1, %v114_v5 }
  0x3f   :  { %518 = vmatprep.subr.bf16.mxu0 %v696_v25  ;;  %s838_s2 = smov [#allocation7]  }
  0x40   :  { %v116_v9 = vrot.slane %v111_v7, %v115_v6  ;;  %v120_v10 = vrot.slane %v111_v7, %v119_v8  ;;  %s562_s13 = sshll.u32 %s838_s2, 4  ;;  %s563_s13 = int_to_ptr.vmem [resolvable:$true] %s562_s13 }
  0x41   :  { %476 = vmatpush1.bf16.msra.mxu1 %v698_v26  ;;  %s804_s14 = scalar_lea.vmem %s563_s13, 512  ;;  %p809_p3 = scmp.lt.s32.totalorder %s563_s13, %s563_s13 }
  0x42   :  { %519 = vmatpush1.bf16.msra.mxu0 %v699_v27  ;;  %477 = vmatprep.subr.bf16.mxu1 %v700_v28  ;;  %p805_p2 = scmp.ne.s32.totalorder %s563_s13, %s804_s14  ;;  %p810_p4 = scmp.lt.s32.totalorder %s804_s14, %s804_s14 }
  0x43   :  { %520 = vmatprep.subr.bf16.mxu0 %v702_v29 }
  0x44   :  { %p811_p5 = por %p810_p4, %p809_p3 }
  0x45   :  { %478 = vmatpush1.bf16.msra.mxu1 %v704_v30 }
  0x46   :  { %521 = vmatpush1.bf16.msra.mxu0 %v705_v31  ;;  %479 = vmatprep.subr.bf16.mxu1 %v706_v32  ;;  %p812_p6 = pnand %p811_p5, %p805_p2 }
  0x47   :  { %522 = vmatprep.subr.bf16.mxu0 %v708_v33 }
  0x49   :  { %480 = vmatpush1.bf16.msra.mxu1 %v710_v34 }
  0x4a   :  { %523 = vmatpush1.bf16.msra.mxu0 %v711_v35  ;;  %481 = vmatprep.subr.bf16.mxu1 %v712_v36 }
  0x4b   :  { %524 = vmatprep.subr.bf16.mxu0 %v714_v37 }
  0x4d   :  { %482 = vmatpush1.bf16.msra.mxu1 %v716_v38 }
  0x4e   :  { %525 = vmatpush1.bf16.msra.mxu0 %v717_v39  ;;  %483 = vmatprep.subr.bf16.mxu1 %v718_v40 }
  0x4f   :  { %526 = vmatprep.subr.bf16.mxu0 %v720_v41 }
  0x51   :  { %484 = vmatpush1.bf16.msra.mxu1 %v722_v42 }
  0x52   :  { %527 = vmatpush1.bf16.msra.mxu0 %v723_v43  ;;  %485 = vmatprep.subr.bf16.mxu1 %v724_v44 }
  0x53   :  { %528 = vmatprep.subr.bf16.mxu0 %v726_v45 }
  0x55   :  { %486 = vmatpush1.bf16.msra.mxu1 %v728_v46 }
  0x56   :  { %529 = vmatpush1.bf16.msra.mxu0 %v729_v48  ;;  %487 = vmatprep.subr.bf16.mxu1 %v730_v49 }
  0x57   :  { %530 = vmatprep.subr.bf16.mxu0 %v732_v50 }
  0x59   :  { %488 = vmatpush1.bf16.msra.mxu1 %v734_v52 }
  0x5a   :  { %531 = vmatpush1.bf16.msra.mxu0 %v735_v53  ;;  %489 = vmatprep.subr.bf16.mxu1 %v736_v54 }
  0x5b   :  { %532 = vmatprep.subr.bf16.mxu0 %v738_v55 }
  0x5d   :  { %490 = vmatpush1.bf16.msra.mxu1 %v740_v56 }
  0x5e   :  { %533 = vmatpush1.bf16.msra.mxu0 %v741_v57  ;;  %491 = vmatprep.subr.bf16.mxu1 %v742_v58 }
  0x5f   :  { %534 = vmatprep.subr.bf16.mxu0 %v744_v59 }
  0x61   :  { %492 = vmatpush1.bf16.msra.mxu1 %v746_v60 }
  0x62   :  { %535 = vmatpush1.bf16.msra.mxu0 %v747_v61  ;;  %493 = vmatprep.subr.bf16.mxu1 %v748_v62 }
  0x63   :  { %536 = vmatprep.subr.bf16.mxu0 %v750_v63 }
  0x65   :  { %494 = vmatpush1.bf16.msra.mxu1 %v752_v0 }
  0x66   :  { %537 = vmatpush1.bf16.msra.mxu0 %v753_v1 }
  0x68   :  { %496 = vmatmul.mubr.bf16.vlgmr.msra.gmra.mrb[0].mxu1 %v754_v2 }
  0x69   :  { %539 = vmatmul.mubr.bf16.vlgmr.msra.gmra.mrb[0].mxu0 %v757_v3 }
 0x13b   :  { %v497_v11 = vpop.f32.mrb[0].mxu1 }
 0x13c   :  { %v540_v12 = vpop.f32.mrb[0].mxu0  ;;  %v498_v13 = vadd.f32 %v497_v11, %v116_v9  ;;  %v499_v14 = vpop.f32.mrb[1].mxu1 }
 0x13d   :  { %v542_v15 = vpop.f32.mrb[1].mxu0  ;;  %v500_v16 = vadd.f32 %v499_v14, %v120_v10  ;;  %v501_v17 = vpop.f32.mrb[2].mxu1 }
 0x13e   :  { %v544_v18 = vpop.f32.mrb[2].mxu0  ;;  %v541_v19 = vadd.f32 %v540_v12, %v498_v13  ;;  %v502_v20 = vadd.f32 %v501_v17, %v116_v9  ;;  %v503_v21 = vpop.f32.mrb[3].mxu1 }
 0x13f   :  { %v546_v22 = vpop.f32.mrb[3].mxu0  ;;  %v543_v23 = vadd.f32 %v542_v15, %v500_v16  ;;  %v504_v24 = vadd.f32 %v503_v21, %v120_v10 }
 0x140   :  { %v549_v25 = vmax.f32 %v541_v19, 0.0  ;;  %v545_v26 = vadd.f32 %v544_v18, %v502_v20 }
 0x141   :  { %v550_v27 = vmax.f32 %v543_v23, 0.0  ;;  %v547_v28 = vadd.f32 %v546_v22, %v504_v24 }
 0x142   :  { %553 = vst [vmem:[#allocation7] sm:$0xff] %v549_v25  ;;  %v551_v29 = vmax.f32 %v545_v26, 0.0 }
 0x143   :  { %554 = vst [vmem:[#allocation7 + $0x8] sm:$0xff] %v550_v27  ;;  %v552_v30 = vmax.f32 %v547_v28, 0.0 }
 0x144   :  { %555 = vst [vmem:[#allocation7 + $0x10] sm:$0xff] %v551_v29 }
 0x145   :  { %556 = vst [vmem:[#allocation7 + $0x18] sm:$0xff] %v552_v30 }
 0x146   :  { %815 = shalt.err (!%p812_p6)
}
 0x147   :  { %s816_s17 = scalar_lea.hbm %s907_s3, 512 }
 0x148   :  { %p817_p7 = scmp.ne.s32.totalorder %s907_s3, %s816_s17  ;;  %p820_p8 = scmp.lt.u32.totalorder %s816_s17, %s907_s3 }
 0x14a   :  { %p822_p9 = pnand %p820_p8, %p817_p7 }
 0x14c   :  { %825 = shalt.err (!%p822_p9)
}
 0x14d   :  { %568 = dma.vmem_to_hbm [thread:$0]  %s563_s13, 512, %s907_s3, [#allocation4], %s833_s22, %s833_s22, %s834_s23  }
 0x14e   :  { %830 = dma.done.wait [#allocation4], 512  }
 0x14f   :  { %831 = vsyncadd [#allocation4], 4294966784 }
 0x150   :  { %572 = vsyncpa [#allocation3], 1 }
 0x151   :  { %573 = vsyncpa [#allocation6], 1 }
 0x152   :  { %574 = vsyncpa [#allocation4], 1 }

</bundles_post_ra>
